<compile_context>
chip_gen: v6e
topology: v6e:2x2x1
jax: 0.10.0
libtpu: 0.0.40
codegen_flags: <defaults>
</compile_context>

<pallas_src>
import numpy as np
import jax
import jax.numpy as jnp
from jax.experimental import pallas as pl
from jax.experimental.pallas import tpu as pltpu


def _adaptive_pool_matrix(in_size: int, out_size: int) -> np.ndarray:
    """Row-stochastic matrix P[out, in] reproducing AdaptiveAvgPool1d windows."""
    P = np.zeros((out_size, in_size), dtype=np.float32)
    for i in range(out_size):
        start = (i * in_size) // out_size
        end = -((-(i + 1) * in_size) // out_size)  # ceil((i+1)*in/out)
        P[i, start:end] = 1.0 / float(end - start)
    return P


def _vmem_physical_bytes() -> int:
    """Physical VMEM per TensorCore; conservative fallback if the query fails."""
    try:
        info = pltpu.get_tpu_info()
        v = int(getattr(info, "vmem_capacity_bytes"))
        if v > 0:
            return v
    except Exception:
        pass
    return 64 * 1024 * 1024  # v7x per-TC VMEM: safe lower bound everywhere


def image_augmentations_forward(x, output_size: int, augmentations_number: int):
    """Pallas equivalent of ImageAugmentations.forward.

    x: [B, C, H, W]  ->  returns [B * augmentations_number, C, S, S]
    """
    B, C, H, W = x.shape
    S = int(output_size)
    A = int(augmentations_number)
    N = B * C
    dt = x.dtype
    isz = jnp.dtype(dt).itemsize
    s_el = S * S

    # Pooling matrices in the input dtype (bf16 inputs -> bf16 MXU operands,
    # f32 accumulation via preferred_element_type).  pw is pre-transposed on
    # the host so the kernel never transposes a resident tile.
    ph = jnp.asarray(_adaptive_pool_matrix(H, S), dtype=dt)        # (S, H)
    pw_t = jnp.asarray(_adaptive_pool_matrix(W, S).T, dtype=dt)    # (W, S)
    x_flat = x.reshape(N, H, W)

    # Lane-dense output: for S < 128 a (..., S, S) store uses only S of the 128
    # lanes, so flatten trailing dims to S*S.  For S >= 128 utilization is
    # already high and the in-kernel relayout is not worth it.
    flatten_out = S < 128

    # ---- VMEM budget & plane-block (tn) selection --------------------------
    vmem_phys = _vmem_physical_bytes()
    budget = int(vmem_phys * 0.5)          # ~64 MiB on v5e/v6e, ~32 MiB on v7x
    vmem_limit = int(vmem_phys * 0.75)     # ~96 MiB on v5e/v6e, ~48 MiB on v7x

    # Per-plane VMEM, including in-kernel intermediates:
    #   2*H*W   input double buffer            (dtype)
    #   3*S*S   output double buffer + scratch (dtype)
    #   2*H*S   t cast to dtype + ph broadcast (dtype)
    #   H*S     t (f32)     S*S  pooled (f32)
    per_plane = (2 * H * W + 3 * s_el + 2 * H * S) * isz + (H * S + s_el) * 4
    budget -= 4 * S * (H + W) * isz        # resident ph / pw_t buffers

    if flatten_out and per_plane * 8 > budget and N > 1:
        flatten_out = False                # tiny-VMEM fallback: no 8-aligned blocks

    max_tn = max(1, budget // per_plane)

    def _make_plan(flat):
        mt = max_tn
        if flat:
            mt = max(8, (mt // 8) * 8)     # flattened out-block: tn is second-minor
        steps = max(1, -(-N // min(mt, N)))
        if steps == 1 and N > 8 and mt >= N:
            steps = 2                      # keep >=2 steps: megacore + DMA overlap
        tn_ = -(-N // steps)
        if flat and steps > 1:
            tn_ = ((tn_ + 7) // 8) * 8     # 8-aligned sublane dim (<= mt by constr.)
        return tn_, steps, steps * tn_

    tn, steps, n_pad = _make_plan(flatten_out)
    if flatten_out and (n_pad - N) * 8 > N:
        flatten_out = False                # alignment padding too costly -> (S,S) tiles
        tn, steps, n_pad = _make_plan(False)

    if n_pad != N:                         # pad planes so the grid tiles evenly
        x_flat = jnp.concatenate(
            [x_flat, jnp.zeros((n_pad - N, H, W), dtype=dt)], axis=0)

    # ---- kernel -------------------------------------------------------------
    def kernel(x_ref, ph_ref, pwt_ref, o_ref, acc_ref):
        @pl.when(pl.program_id(1) == 0)
        def _():
            # W-pool: one flat big-M MXU matmul, f32 accumulation.
            t = jnp.dot(x_ref[...].reshape(tn * H, W), pwt_ref[...],
                        preferred_element_type=jnp.float32)          # (tn*H, S)
            # Back to input dtype so the second matmul runs at native MXU rate
            # for bf16 inputs (accumulation stays f32 below).
            t = t.astype(dt).reshape(tn, H, S)
            # H-pool: batched MXU matmul.  Mosaic's dot_general needs matching
            # batch ranks, so ph is broadcast over the plane axis -- kept in the
            # low-precision input dtype and fully counted in the VMEM budget.
            ph_b = jnp.broadcast_to(ph_ref[...][None], (tn, S, H))
            pooled = jnp.einsum("nsh,nhj->nsj", ph_b, t,
                                preferred_element_type=jnp.float32)   # (tn, S, S)
            if flatten_out:
                pooled = pooled.reshape(tn, s_el)                     # lane-dense store
            acc_ref[...] = pooled.astype(acc_ref.dtype)

        # One replica per inner grid step: replication costs no extra HBM reads
        # and no recompute; the pooled block stays resident in VMEM scratch.
        o_ref[...] = acc_ref[...]

    if flatten_out:
        out_shape = jax.ShapeDtypeStruct((A, n_pad, s_el), dt)
        out_spec = pl.BlockSpec((None, tn, s_el), lambda i, a: (a, i, 0))
        acc_shape = pltpu.VMEM((tn, s_el), dt)
    else:
        out_shape = jax.ShapeDtypeStruct((A, n_pad, S, S), dt)
        out_spec = pl.BlockSpec((None, tn, S, S), lambda i, a: (a, i, 0, 0))
        acc_shape = pltpu.VMEM((tn, S, S), dt)

    out = pl.pallas_call(
        kernel,
        out_shape=out_shape,
        grid_spec=pltpu.PrefetchScalarGridSpec(
            num_scalar_prefetch=0,
            grid=(n_pad // tn, A),                      # replica axis innermost
            in_specs=[
                pl.BlockSpec((tn, H, W), lambda i, a: (i, 0, 0)),  # resident across a
                pl.BlockSpec((S, H), lambda i, a: (0, 0)),         # resident matrices
                pl.BlockSpec((W, S), lambda i, a: (0, 0)),
            ],
            out_specs=out_spec,
            scratch_shapes=[acc_shape],
        ),
        compiler_params=pltpu.CompilerParams(
            dimension_semantics=("parallel", "arbitrary"),
            vmem_limit_bytes=vmem_limit,
        ),
        cost_estimate=pl.CostEstimate(
            flops=2 * N * S * H * (W + S),
            bytes_accessed=(N * H * W + A * N * s_el + S * (H + W)) * isz,
            transcendentals=0,
        ),
    )(x_flat, ph, pw_t)

    if n_pad != N:
        out = out[:, :N]
    # (A, N, S*S) / (A, N, S, S) -> (A*B, C, S, S): contiguity-preserving
    # reshapes reproducing the torch.tile ordering (replica-major, then batch).
    out = out.reshape(A * B, C, S, S)

    # TODO(synk): Kornia RandomAffine / RandomPerspective are stochastic
    # geometric warps with no deterministic Pallas equivalent; the augmented
    # replicas (rows B:) are passed through un-warped (identity augmentation).
    return out


def _reference(x, output_size: int, augmentations_number: int):
    """Plain-JAX reference: adaptive avg pool + tile (augmentations = identity)."""
    B, C, H, W = x.shape
    S = output_size
    ph = jnp.asarray(_adaptive_pool_matrix(H, S))
    pw = jnp.asarray(_adaptive_pool_matrix(W, S))
    pooled = jnp.einsum("sh,bchw,tw->bcst", ph, x.astype(jnp.float32), pw)
    pooled = pooled.astype(x.dtype)
    return jnp.tile(pooled, (augmentations_number, 1, 1, 1))


if __name__ == "__main__":
    B, C, H, W = 2, 4, 16, 16
    output_size = 8
    augmentations_number = 3

    key = jax.random.PRNGKey(0)
    x = jax.random.normal(key, (B, C, H, W), dtype=jnp.float32)

    out = image_augmentations_forward(x, output_size, augmentations_number)
    out = jax.block_until_ready(out)

    ref = _reference(x, output_size, augmentations_number)

    assert out.shape == (B * augmentations_number, C, output_size, output_size), out.shape
    np.testing.assert_allclose(np.asarray(out), np.asarray(ref), rtol=1e-5, atol=1e-5)

    print("KERNEL_OK")
</pallas_src>

<mosaic_0001>
module attributes {stable_mosaic.version = 11 : i64} {
  func.func @kernel(%arg0: i32, %arg1: i32, %arg2: memref<8x16x16xf32, #tpu.memory_space<vmem>>, %arg3: memref<8x16xf32, #tpu.memory_space<vmem>>, %arg4: memref<16x8xf32, #tpu.memory_space<vmem>>, %arg5: memref<1x8x64xf32, #tpu.memory_space<vmem>>, %arg6: memref<8x64xf32, #tpu.memory_space<vmem>>) attributes {dimension_semantics = [#tpu.dimension_semantics<parallel>, #tpu.dimension_semantics<arbitrary>], iteration_bounds = array<i64: 1, 3>, scalar_prefetch = 0 : i64, scratch_operands = 1 : i64, tpu.core_type = #tpu.core_type<tc>, window_params = [{transform_indices = @transform_0, window_bounds = array<i64: 8, 16, 16>}, {pipeline_mode = #tpu.pipeline_mode<synchronous>, transform_indices = @transform_1, window_bounds = array<i64: 8, 16>}, {pipeline_mode = #tpu.pipeline_mode<synchronous>, transform_indices = @transform_2, window_bounds = array<i64: 16, 8>}, {transform_indices = @transform_3, window_bounds = array<i64: 1, 8, 64>}]} {
    %c0_i32 = arith.constant 0 : i32
    %0 = arith.cmpi eq, %arg1, %c0_i32 : i32
    %1 = arith.extui %0 : i1 to i32
    %c0_i32_0 = arith.constant 0 : i32
    %2 = arith.cmpi ne, %1, %c0_i32_0 : i32
    scf.if %2 {
      %c0_5 = arith.constant 0 : index
      %c0_6 = arith.constant 0 : index
      %c0_7 = arith.constant 0 : index
      %7 = vector.load %arg2[%c0_5, %c0_6, %c0_7] : memref<8x16x16xf32, #tpu.memory_space<vmem>>, vector<8x16x16xf32>
      %8 = vector.shape_cast %7 : vector<8x16x16xf32> to vector<128x16xf32>
      %c0_8 = arith.constant 0 : index
      %c0_9 = arith.constant 0 : index
      %9 = vector.load %arg4[%c0_8, %c0_9] : memref<16x8xf32, #tpu.memory_space<vmem>>, vector<16x8xf32>
      %cst = arith.constant dense<0.000000e+00> : vector<128x8xf32>
      %10 = tpu.matmul %8, %9, %cst {dimension_numbers = #tpu.dot_dimension_numbers<[1], [0], [0], [1], [0, 0, 1, 1], [], []>} : vector<128x16xf32>, vector<16x8xf32>, vector<128x8xf32> -> vector<128x8xf32>
      %11 = vector.shape_cast %10 : vector<128x8xf32> to vector<8x16x8xf32>
      %c0_10 = arith.constant 0 : index
      %c0_11 = arith.constant 0 : index
      %12 = vector.load %arg3[%c0_10, %c0_11] : memref<8x16xf32, #tpu.memory_space<vmem>>, vector<8x16xf32>
      %13 = vector.shape_cast %12 : vector<8x16xf32> to vector<1x8x16xf32>
      %14 = vector.shape_cast %13 : vector<1x8x16xf32> to vector<1x8x16xf32>
      %15 = vector.broadcast %14 : vector<1x8x16xf32> to vector<8x8x16xf32>
      "tpu.trace_start"() <{level = 10 : i32, message = "nsh,nhj->nsj"}> : () -> ()
      %cst_12 = arith.constant dense<0.000000e+00> : vector<8x8x8xf32>
      %16 = tpu.matmul %15, %11, %cst_12 {dimension_numbers = #tpu.dot_dimension_numbers<[2], [1], [1], [2], [0, 0, 0, 1, 1, 2], [0], [0]>} : vector<8x8x16xf32>, vector<8x16x8xf32>, vector<8x8x8xf32> -> vector<8x8x8xf32>
      "tpu.trace_stop"() : () -> ()
      %17 = vector.shape_cast %16 : vector<8x8x8xf32> to vector<8x64xf32>
      %c0_13 = arith.constant 0 : index
      %c0_14 = arith.constant 0 : index
      %18 = vector.load %arg6[%c0_13, %c0_14] : memref<8x64xf32, #tpu.memory_space<vmem>>, vector<8x64xf32>
      tpu.vector_store %arg6[%c0_13, %c0_14], %17 {strides = array<i32>} : memref<8x64xf32, #tpu.memory_space<vmem>>, vector<8x64xf32>,
    } else {
    }
    %c0 = arith.constant 0 : index
    %c0_1 = arith.constant 0 : index
    %3 = vector.load %arg6[%c0, %c0_1] : memref<8x64xf32, #tpu.memory_space<vmem>>, vector<8x64xf32>
    %c0_2 = arith.constant 0 : index
    %c0_3 = arith.constant 0 : index
    %c0_4 = arith.constant 0 : index
    %4 = vector.load %arg5[%c0_2, %c0_3, %c0_4] : memref<1x8x64xf32, #tpu.memory_space<vmem>>, vector<1x8x64xf32>
    %5 = vector.shape_cast %4 : vector<1x8x64xf32> to vector<8x64xf32>
    %6 = vector.shape_cast %3 : vector<8x64xf32> to vector<1x8x64xf32>
    tpu.vector_store %arg5[%c0_2, %c0_3, %c0_4], %6 {strides = array<i32>} : memref<1x8x64xf32, #tpu.memory_space<vmem>>, vector<1x8x64xf32>,
    return
  }
  func.func @transform_0(%arg0: i32, %arg1: i32) -> (i32, i32, i32) {
    %c0_i32 = arith.constant 0 : i32
    %c0_i32_0 = arith.constant 0 : i32
    %c0_i32_1 = arith.constant 0 : i32
    return %arg0, %c0_i32, %c0_i32_0 : i32, i32, i32
  }
  func.func @transform_1(%arg0: i32, %arg1: i32) -> (i32, i32) {
    %c0_i32 = arith.constant 0 : i32
    %c0_i32_0 = arith.constant 0 : i32
    %c0_i32_1 = arith.constant 0 : i32
    return %c0_i32, %c0_i32_0 : i32, i32
  }
  func.func @transform_2(%arg0: i32, %arg1: i32) -> (i32, i32) {
    %c0_i32 = arith.constant 0 : i32
    %c0_i32_0 = arith.constant 0 : i32
    %c0_i32_1 = arith.constant 0 : i32
    return %c0_i32, %c0_i32_0 : i32, i32
  }
  func.func @transform_3(%arg0: i32, %arg1: i32) -> (i32, i32, i32) {
    %c0_i32 = arith.constant 0 : i32
    %c0_i32_0 = arith.constant 0 : i32
    return %arg1, %arg0, %c0_i32 : i32, i32, i32
  }
}

</mosaic_0001>

<bundles_post_ra>
// kernel: tpu_custom_call.1
= control target key start
LH: loop header
LB: loop body
LE: loop exit
PB: predicated region body
PF: predicated region fallthrough
CT: control target
= control target key end

     0   :  { %8 = vsyncpa [#allocation4], 0  ;;  %s1812_s0 = inlined_call_operand.hbm [shape: f32[8,16,16], index: 0, kind: input, shape index: {}]   ;;  %s1813_s1 = inlined_call_operand.vmem [shape: f32[8,16], index: 1, kind: input, shape index: {}]   ;;  %s1814_s2 = inlined_call_operand.vmem [shape: f32[16,8], index: 2, kind: input, shape index: {}]   ;;  %s1815_s3 = inlined_call_operand.hbm [shape: f32[3,8,64], index: 3, kind: output, shape index: {}]  }
   0x1   :  { %9 = vsyncpa [#allocation5], 0 }
   0x2   :  { %11 = vsyncpa [#allocation5 + $0x1], 0  ;;  %s1619_s12 = smov 0   ;;  %s1621_s13 = smov 0  }
   0x3   :  { %s1623_s14 = smov 0   ;;  %s1625_s15 = smov 0  }
   0x4   :  { %s1627_s16 = smov 0   ;;  %s1629_s17 = smov 0  }
   0x5 LB: > { %s1235_s18 = sadd.s32 4294967295, %s1582_s17   ;;  %s1236_s19 = sadd.s32 4294967294, %s1582_s17   ;;  %s1582_s17 = sphi %s1629_s17, %s17_s17   ;;  %s1578_s16 = sphi %s1627_s16, %s1824_s16   ;;  %s1574_s15 = sphi %s1625_s15, %s1823_s15   ;;  %s1570_s14 = sphi %s1623_s14, %s1822_s14   ;;  %s1566_s13 = sphi %s1621_s13, %s1821_s13   ;;  %s1562_s12 = sphi %s1619_s12, %s1820_s12  }
   0x6   : > { %s26_s20 = sadd.s32 1, %s1578_s16  ;;  %s106_s21 = sadd.s32 1, %s1570_s14 }
   0x7   : > { %p27_p0 = scmp.ge.s32.totalorder %s26_s20, 3  ;;  %p116_p1 = scmp.ne.s32.totalorder %s1570_s14, %s1566_s13 }
   0x8   : > { %p117_p2 = scmp.eq.s32.totalorder %s1235_s18, 2  ;;  %p122_p3 = scmp.ne.s32.totalorder %s1566_s13, %s1562_s12 }
   0x9   : > { %s1826_s20 = smov (%p27_p0, %s26_s20), 0  ;;  %p123_p5 = scmp.eq.s32.totalorder %s1236_s19, 2 }
   0xa   : > { %p1659_p4 = por %p117_p2, %p116_p1  ;;  %s101_s23 = ssub.s32 %s1578_s16, %s1826_s20 }
   0xb   : > { %p1237_p6 = scmp.ge.s32.totalorder %s1582_s17, 1  ;;  %p104_p7 = scmp.eq.s32.totalorder %s101_s23, 0 }
   0xc   : > { %p1666_p8 = por %p123_p5, %p122_p3  ;;  %p130_p9 = scmp.lt.s32.totalorder %s1582_s17, 4 }
   0xd   : > { %s1672_s25 = scalar_select %p104_p7, %s1570_s14, %s106_s21  }
   0xe   : > { %p1674_p10 = pnand %p1237_p6, %p130_p9  ;;  %p1678_p11 = scmp.eq.s32.totalorder %s1235_s18, 0 }
   0xf   : > { %s1584_s28 = smov [#allocation3]  }
  0x10   : > { %p1403_p12 = pneg %p1674_p10  ;;  %s146_s29 = sshll.u32 %s1584_s28, 4  ;;  %s147_s29 = int_to_ptr.vmem [resolvable:$true] %s146_s29 }
  0x11   : > { %s1487_s30 = scalar_lea.vmem %s147_s29, 2048  ;;  %p1495_p5 = scmp.lt.s32.totalorder %s147_s29, %s147_s29 }
  0x12   : > { %p1404_p13 = pnand %p1678_p11, %p1403_p12  ;;  %p1488_p1 = scmp.ne.s32.totalorder %s147_s29, %s1487_s30 }
  0x13   : > { %p1496_p6 = scmp.lt.s32.totalorder %s1487_s30, %s1487_s30 }
  0x14   : > { %p1478_p0 = pneg %p1404_p13 }
  0x15   : > { %p1497_p7 = por %p1496_p6, %p1495_p5 }
  0x16   : > { %p1490_p2 = pnand %p1488_p1, %p1478_p0 }
  0x18   : > { %p1491_p3 = pneg %p1490_p2 }
  0x1a   : > { %p1498_p9 = pnand %p1497_p7, %p1491_p3 }
  0x1c   : > { %1501 = shalt.err (!%p1498_p9)
}
  0x1d   : > { %s1585_s4 = smov 128   ;;  %s1586_s5 = smov 8  }
  0x1e   : > { %1406 = dma.hbm_to_vmem [thread:$0]  (!%p1404_p13), %s1812_s0, 2048, %s147_s29, [#allocation4], %s1585_s4, %s1585_s4, %s1586_s5  }
  0x1f   : > { %168 = sbr.rel (%p1674_p10) target bundleno = 628 (0x274), region = 32 }
  0x24   : > { %1553 = dma.done.wait (%p1678_p11), [#allocation4], 2048  }
  0x25   : > { %1555 = vsyncadd (%p1678_p11), [#allocation4], 4294965248  ;;  %s184_s8 = sand.u32 1, %s1566_s13   ;;  %p1242_p12 = scmp.ne.s32.totalorder %s1574_s15, 0 }
  0x26   : > { %s1698_s9 = sshll.u32 %s184_s8, 3  ;;  %s1591_s27 = smov (!%p1242_p12), 24  }
  0x27   : > { %s186_s10 = scalar_lea.vmem [#allocation6], %s1698_s9  ;;  %191 = sbr.rel (%p1242_p12) target bundleno = 605 (0x25d), region = 40 }
  0x28   : > { %s1592_s28 = smov (!%p1242_p12), 8   ;;  %s1593_s29 = smov (!%p1242_p12), 32  }
  0x29   : > { %s1594_s30 = smov (!%p1242_p12), 16   ;;  %s1595_s4 = smov (!%p1242_p12), 48  }
  0x2a   : > { %s1596_s5 = smov (!%p1242_p12), 40   ;;  %s1597_s6 = smov (!%p1242_p12), 56  }
  0x2c   : > { %v209_v0 = vld [vmem:[%s1814_s2 + $0x8] sm:$0xff]  ;;  %v208_v1 = vld [vmem:[%s1814_s2] sm:$0xff]  ;;  %vm210_vm0 = vcmask 130048   ;;  %v193_v3 = vld [vmem:[#allocation3 + $0x8] sm:$0xff]  ;;  %v1587_v18 = vmov 0.0   ;;  %vm1588_vm1 = vmmov 0   ;;  %v973_v46 = vlaneseq }
  0x2d   : > { %v192_v2 = vld [vmem:[#allocation3] sm:$0xff]  ;;  %1313 = vmatprep.subr.mxu0 %v209_v0  ;;  %v194_v4 = vld [vmem:[#allocation3 + $0x10] sm:$0xff]  ;;  %v195_v5 = vld [vmem:[#allocation3 + $0x18] sm:$0xff]  ;;  %1341 = vmatprep.subr.mxu1 %v1587_v18  ;;  %v1589_v44 = vmov 1983009808   ;;  %vm1132_vm2 = vcmask 64512  }
  0x2e   : > { %1317 = vmatprep.mubr.msk.f32.mxu0 %vm210_vm0, %v192_v2  ;;  %1314 = vmatpush3.msra.mxu0 %v209_v0  ;;  %v196_v6 = vld [vmem:[#allocation3 + $0x20] sm:$0xff]  ;;  %v197_v7 = vld [vmem:[#allocation3 + $0x28] sm:$0xff]  ;;  %v198_v8 = vld [vmem:[#allocation3 + $0x30] sm:$0xff]  ;;  %v971_v45 = vunpack.c.l.s4 %v1589_v44  ;;  %v974_v50 = vshrl.u32 %v973_v46, 7  ;;  %v1590_v54 = vmov 1934713408  }
  0x2f   : > { %1315 = vmatprep.subr.mxu0 %v208_v1  ;;  %v199_v9 = vld [vmem:[#allocation3 + $0x38] sm:$0xff]  ;;  %v200_v10 = vld [vmem:[#allocation3 + $0x40] sm:$0xff]  ;;  %v201_v11 = vld [vmem:[#allocation3 + $0x48] sm:$0xff]  ;;  %1345 = vmatprep.mubr.msk.f32.mxu1 %vm1588_vm1, %v1587_v18  ;;  %v1035_v55 = vunpack.c.l.s4 %v1590_v54  ;;  %vm1135_vm3 = vcmask 195584   ;;  %vm1137_vm4 = vcmask 261120   ;;  %vm1139_vm5 = vcmask 326656  }
  0x30   : > { %1316 = vmatpush3.msra.mxu0 %v208_v1  ;;  %v202_v12 = vld [vmem:[#allocation3 + $0x50] sm:$0xff]  ;;  %v203_v13 = vld [vmem:[#allocation3 + $0x58] sm:$0xff]  ;;  %v204_v14 = vld [vmem:[#allocation3 + $0x60] sm:$0xff]  ;;  %v972_v49 = vunpack.c.0.s8 %v971_v45  ;;  %vm1141_vm6 = vcmask 392192   ;;  %vm1143_vm7 = vcmask 457728   ;;  %vm1145_vm8 = vcmask 523264  }
  0x31   : > { %1318 = vmatmul.mubr.msk.f32.vlgmr.msra.gmra.mxu0 %vm210_vm0, %v193_v3  ;;  %v205_v15 = vld [vmem:[#allocation3 + $0x68] sm:$0xff]  ;;  %v206_v16 = vld [vmem:[#allocation3 + $0x70] sm:$0xff]  ;;  %v207_v17 = vld [vmem:[#allocation3 + $0x78] sm:$0xff]  ;;  %v1036_v62 = vunpack.c.0.s8 %v1035_v55 }
  0x32   : > { %1320 = vmatprep.mubr.msk.f32.mxu0 %vm210_vm0, %v194_v4  ;;  %v404_v20 = vld [vmem:[%s1813_s1] sm:$0xff]  ;;  %v975_v57 = vsub.s32 %v972_v49, %v974_v50 }
  0x35   : > { %1321 = vmatmul.mubr.msk.f32.gmra.mxu0 %vm210_vm0, %v195_v5 }
  0x36   : > { %1323 = vmatprep.mubr.msk.f32.mxu0 %vm210_vm0, %v196_v6 }
  0x39   : > { %1324 = vmatmul.mubr.msk.f32.gmra.mxu0 %vm210_vm0, %v197_v7 }
  0x3a   : > { %1326 = vmatprep.mubr.msk.f32.mxu0 %vm210_vm0, %v198_v8 }
  0x3d   : > { %1327 = vmatmul.mubr.msk.f32.gmra.mxu0 %vm210_vm0, %v199_v9  ;;  %v1039_v9 = vsub.s32 %v1036_v62, %v974_v50 }
  0x3e   : > { %1329 = vmatprep.mubr.msk.f32.mxu0 %vm210_vm0, %v200_v10 }
  0x41   : > { %1330 = vmatmul.mubr.msk.f32.gmra.mxu0 %vm210_vm0, %v201_v11 }
  0x42   : > { %1332 = vmatprep.mubr.msk.f32.mxu0 %vm210_vm0, %v202_v12 }
  0x45   : > { %1333 = vmatmul.mubr.msk.f32.gmra.mxu0 %vm210_vm0, %v203_v13 }
  0x46   : > { %1335 = vmatprep.mubr.msk.f32.mxu0 %vm210_vm0, %v204_v14 }
  0x49   : > { %1336 = vmatmul.mubr.msk.f32.gmra.mxu0 %vm210_vm0, %v205_v15 }
  0x4a   : > { %1338 = vmatprep.mubr.msk.f32.mxu0 %vm210_vm0, %v206_v16 }
  0x4d   : > { %1339 = vmatmul.mubr.msk.f32.gmra.mxu0 %vm210_vm0, %v207_v17 }
  0xf1   : > { %v1319_v19 = vpop.f32.mrf.mxu0 }
  0xf2   : > { %1342 = vmatpush3.msra.mxu1 %v1319_v19 }
  0xf3   : > { %v325_v21 = vpop.f32.mrf.mxu0  ;;  %1343 = vmatprep.subr.mxu1 %v1587_v18 }
  0xf4   : > { %1344 = vmatpush3.msra.mxu1 %v325_v21 }
  0xf5   : > { %v1322_v22 = vpop.f32.mrf.mxu0  ;;  %1346 = vmatmul.mubr.msk.f32.vlgmr.msra.gmra.mxu1 %vm210_vm0, %v404_v20  ;;  %1348 = vmatprep.subr.mxu1 %v1587_v18 }
  0xf6   : > { %1349 = vmatpush3.msra.mxu1 %v1322_v22  ;;  %1352 = vmatprep.mubr.msk.f32.mxu1 %vm1588_vm1, %v1587_v18 }
  0xf7   : > { %v335_v23 = vpop.f32.mrf.mxu0  ;;  %1350 = vmatprep.subr.mxu1 %v1587_v18 }
  0xf8   : > { %1351 = vmatpush3.msra.mxu1 %v335_v23 }
  0xf9   : > { %v1325_v24 = vpop.f32.mrf.mxu0  ;;  %1353 = vmatmul.mubr.msk.f32.vlgmr.msra.gmra.mxu1 %vm210_vm0, %v404_v20  ;;  %1355 = vmatprep.subr.mxu1 %v1587_v18 }
  0xfa   : > { %1356 = vmatpush3.msra.mxu1 %v1325_v24  ;;  %1359 = vmatprep.mubr.msk.f32.mxu1 %vm1588_vm1, %v1587_v18 }
  0xfb   : > { %v345_v25 = vpop.f32.mrf.mxu0  ;;  %1357 = vmatprep.subr.mxu1 %v1587_v18 }
  0xfc   : > { %1358 = vmatpush3.msra.mxu1 %v345_v25 }
  0xfd   : > { %v1328_v26 = vpop.f32.mrf.mxu0  ;;  %1360 = vmatmul.mubr.msk.f32.vlgmr.msra.gmra.mxu1 %vm210_vm0, %v404_v20  ;;  %1362 = vmatprep.subr.mxu1 %v1587_v18 }
  0xfe   : > { %1363 = vmatpush3.msra.mxu1 %v1328_v26  ;;  %1366 = vmatprep.mubr.msk.f32.mxu1 %vm1588_vm1, %v1587_v18 }
  0xff   : > { %v355_v27 = vpop.f32.mrf.mxu0  ;;  %1364 = vmatprep.subr.mxu1 %v1587_v18 }
 0x100   : > { %1365 = vmatpush3.msra.mxu1 %v355_v27 }
 0x101   : > { %v1331_v28 = vpop.f32.mrf.mxu0  ;;  %1367 = vmatmul.mubr.msk.f32.vlgmr.msra.gmra.mxu1 %vm210_vm0, %v404_v20  ;;  %1369 = vmatprep.subr.mxu1 %v1587_v18 }
 0x102   : > { %1370 = vmatpush3.msra.mxu1 %v1331_v28  ;;  %1373 = vmatprep.mubr.msk.f32.mxu1 %vm1588_vm1, %v1587_v18 }
 0x103   : > { %v365_v29 = vpop.f32.mrf.mxu0  ;;  %1371 = vmatprep.subr.mxu1 %v1587_v18 }
 0x104   : > { %1372 = vmatpush3.msra.mxu1 %v365_v29 }
 0x105   : > { %v1334_v30 = vpop.f32.mrf.mxu0  ;;  %1374 = vmatmul.mubr.msk.f32.vlgmr.msra.gmra.mxu1 %vm210_vm0, %v404_v20  ;;  %1376 = vmatprep.subr.mxu1 %v1587_v18 }
 0x106   : > { %1377 = vmatpush3.msra.mxu1 %v1334_v30  ;;  %1380 = vmatprep.mubr.msk.f32.mxu1 %vm1588_vm1, %v1587_v18 }
 0x107   : > { %v375_v31 = vpop.f32.mrf.mxu0  ;;  %1378 = vmatprep.subr.mxu1 %v1587_v18 }
 0x108   : > { %1379 = vmatpush3.msra.mxu1 %v375_v31 }
 0x109   : > { %v1337_v32 = vpop.f32.mrf.mxu0  ;;  %1381 = vmatmul.mubr.msk.f32.vlgmr.msra.gmra.mxu1 %vm210_vm0, %v404_v20  ;;  %1383 = vmatprep.subr.mxu1 %v1587_v18 }
 0x10a   : > { %1384 = vmatpush3.msra.mxu1 %v1337_v32  ;;  %1387 = vmatprep.mubr.msk.f32.mxu1 %vm1588_vm1, %v1587_v18 }
 0x10b   : > { %v385_v33 = vpop.f32.mrf.mxu0  ;;  %1385 = vmatprep.subr.mxu1 %v1587_v18 }
 0x10c   : > { %1386 = vmatpush3.msra.mxu1 %v385_v33 }
 0x10d   : > { %v1340_v34 = vpop.f32.mrf.mxu0  ;;  %1388 = vmatmul.mubr.msk.f32.vlgmr.msra.gmra.mxu1 %vm210_vm0, %v404_v20  ;;  %1390 = vmatprep.subr.mxu1 %v1587_v18 }
 0x10e   : > { %1391 = vmatpush3.msra.mxu1 %v1340_v34  ;;  %1394 = vmatprep.mubr.msk.f32.mxu1 %vm1588_vm1, %v1587_v18 }
 0x10f   : > { %v395_v35 = vpop.f32.mrf.mxu0  ;;  %1392 = vmatprep.subr.mxu1 %v1587_v18 }
 0x110   : > { %1393 = vmatpush3.msra.mxu1 %v395_v35 }
 0x111   : > { %1395 = vmatmul.mubr.msk.f32.vlgmr.msra.gmra.mxu1 %vm210_vm0, %v404_v20 }
 0x1b5   : > { %v474_v36 = vpop.f32.mrf.mxu1 }
 0x1b7   : > { %v1347_v37 = vpop.f32.mrf.mxu1 }
 0x1b9   : > { %v544_v38 = vpop.f32.mrf.mxu1 }
 0x1bb   : > { %v1354_v39 = vpop.f32.mrf.mxu1 }
 0x1bd   : > { %v614_v40 = vpop.f32.mrf.mxu1 }
 0x1be   : > { %v968_v56 = vcombine.low %v474_v36, %v614_v40  ;;  %v969_v1 = vcombine.high %v474_v36, %v614_v40 }
 0x1bf   : > { %v1361_v41 = vpop.f32.mrf.mxu1 }
 0x1c0   : > { %v976_v2 = vrot.slane %v968_v56, %v975_v57  ;;  %v983_v15 = vrot.slane %v969_v1, %v975_v57 }
 0x1c1   : > { %v684_v42 = vpop.f32.mrf.mxu1 }
 0x1c2   : > { %v984_v52 = vcombine.low %v544_v38, %v684_v42  ;;  %v985_v59 = vcombine.high %v544_v38, %v684_v42 }
 0x1c3   : > { %v1368_v43 = vpop.f32.mrf.mxu1 }
 0x1c4   : > { %v992_v60 = vrot.slane %v984_v52, %v975_v57  ;;  %v999_v6 = vrot.slane %v985_v59, %v975_v57 }
 0x1c5   : > { %v754_v47 = vpop.f32.mrf.mxu1 }
 0x1c6   : > { %v1033_v8 = vcombine.high %v976_v2, %v992_v60  ;;  %v1032_v10 = vcombine.low %v976_v2, %v992_v60  ;;  %v1048_v19 = vcombine.low %v983_v15, %v999_v6  ;;  %v1049_v29 = vcombine.high %v983_v15, %v999_v6 }
 0x1c7   : > { %v1375_v48 = vpop.f32.mrf.mxu1 }
 0x1c8   : > { %v1047_v20 = vrot.slane %v1033_v8, %v1039_v9  ;;  %v1040_v22 = vrot.slane %v1032_v10, %v1039_v9  ;;  %v1056_v30 = vrot.slane %v1048_v19, %v1039_v9  ;;  %v1063_v34 = vrot.slane %v1049_v29, %v1039_v9 }
 0x1c9   : > { %v824_v51 = vpop.f32.mrf.mxu1 }
 0x1cb   : > { %v1382_v53 = vpop.f32.mrf.mxu1 }
 0x1cd   : > { %v894_v58 = vpop.f32.mrf.mxu1 }
 0x1ce   : > { %v1000_v63 = vcombine.low %v754_v47, %v894_v58  ;;  %v1001_v0 = vcombine.high %v754_v47, %v894_v58 }
 0x1cf   : > { %v1389_v61 = vpop.f32.mrf.mxu1 }
 0x1d0   : > { %v1008_v11 = vrot.slane %v1000_v63, %v975_v57  ;;  %v1015_v12 = vrot.slane %v1001_v0, %v975_v57 }
 0x1d1   : > { %v964_v3 = vpop.f32.mrf.mxu1 }
 0x1d2   : > { %v1016_v4 = vcombine.low %v824_v51, %v964_v3  ;;  %v1017_v5 = vcombine.high %v824_v51, %v964_v3 }
 0x1d3   : > { %v1396_v7 = vpop.f32.mrf.mxu1 }
 0x1d4   : > { %v1024_v13 = vrot.slane %v1016_v4, %v975_v57  ;;  %v1031_v14 = vrot.slane %v1017_v5, %v975_v57 }
 0x1d6   : > { %v1080_v16 = vcombine.low %v1015_v12, %v1031_v14  ;;  %v1065_v17 = vcombine.high %v1008_v11, %v1024_v13  ;;  %v1064_v18 = vcombine.low %v1008_v11, %v1024_v13  ;;  %v1081_v24 = vcombine.high %v1015_v12, %v1031_v14 }
 0x1d8   : > { %v1079_v21 = vrot.slane %v1065_v17, %v1039_v9  ;;  %v1072_v23 = vrot.slane %v1064_v18, %v1039_v9  ;;  %v1088_v28 = vrot.slane %v1080_v16, %v1039_v9  ;;  %v1095_v33 = vrot.slane %v1081_v24, %v1039_v9 }
 0x1da   : > { %v1099_v25 = vcombine.high %v1047_v20, %v1079_v21  ;;  %v1097_v26 = vcombine.high %v1040_v22, %v1072_v23  ;;  %v1096_v27 = vcombine.low %v1040_v22, %v1072_v23  ;;  %v1100_v31 = vcombine.low %v1056_v30, %v1088_v28 }
 0x1db   : > { %v1098_v32 = vcombine.low %v1047_v20, %v1079_v21  ;;  %v1102_v35 = vcombine.low %v1063_v34, %v1095_v33  ;;  %v1101_v36 = vcombine.high %v1056_v30, %v1088_v28  ;;  %v1103_v37 = vcombine.high %v1063_v34, %v1095_v33 }
 0x1dc   : > { %1113 = vrot.lane.b32.xlu1 %v1099_v25, %s1591_s27  ;;  %1105 = vrot.lane.b32.xlu0 %v1097_v26, %s1592_s28 }
 0x1e0   : > { %1117 = vrot.lane.b32.xlu1 %v1100_v31, %s1593_s29  ;;  %1109 = vrot.lane.b32.xlu0 %v1098_v32, %s1594_s30 }
 0x1e4   : > { %1125 = vrot.lane.b32.xlu1 %v1102_v35, %s1595_s4  ;;  %1121 = vrot.lane.b32.xlu0 %v1101_v36, %s1596_s5 }
 0x1e8   : > { %1129 = vrot.lane.b32.xlu0 %v1103_v37, %s1597_s6 }
 0x24e   : > { %v1114_v38 = vpop.permute.xlu1 %1113  ;;  %v1106_v39 = vpop.permute.xlu0 %1105 }
 0x24f   : > { %v1133_v40 = vsel %vm1132_vm2, %v1096_v27, %v1106_v39 }
 0x252   : > { %v1118_v41 = vpop.permute.xlu1 %1117  ;;  %v1110_v42 = vpop.permute.xlu0 %1109 }
 0x253   : > { %v1134_v43 = vsel %vm210_vm0, %v1133_v40, %v1110_v42 }
 0x254   : > { %v1136_v44 = vsel %vm1135_vm3, %v1134_v43, %v1114_v38 }
 0x255   : > { %v1138_v45 = vsel %vm1137_vm4, %v1136_v44, %v1118_v41 }
 0x256   : > { %v1122_v46 = vpop.permute.xlu0 %1121  ;;  %v1126_v47 = vpop.permute.xlu1 %1125 }
 0x257   : > { %v1140_v48 = vsel %vm1139_vm5, %v1138_v45, %v1122_v46 }
 0x258   : > { %v1142_v50 = vsel %vm1141_vm6, %v1140_v48, %v1126_v47 }
 0x25a   : > { %v1130_v49 = vpop.permute.xlu0 %1129 }
 0x25b   : > { %v1144_v51 = vsel %vm1143_vm7, %v1142_v50, %v1130_v49 }
 0x25c   : > { %1146 = vst.msk [vmem:[#allocation2] sm:$0xff] %vm1145_vm8, %v1144_v51 }
 0x25d PF: > { %vm1148_vm9 = vcmask 523264   ;;  %s1268_s7 = sshll.u32 %s1574_s15, 7  ;;  %s1165_s21 = sshll.u32 %s186_s10, 4  ;;  %s1166_s21 = int_to_ptr.vmem [resolvable:$true] %s1165_s21 }
 0x25e   : > { %s1163_s19 = scalar_lea.hbm %s1815_s3, %s1268_s7  ;;  %s1151_s23 = scalar_lea.sflag [#allocation5], %s184_s8 }
 0x25f   : > { %s1502_s26 = scalar_lea.vmem %s1166_s21, 128  ;;  %s1598_s27 = smov [#allocation6]  }
 0x260   : > { %p1503_p10 = scmp.ne.s32.totalorder %s1166_s21, %s1502_s26  ;;  %s1506_s28 = sshll.u32 %s1598_s27, 4  ;;  %s1507_s28 = int_to_ptr.vmem [resolvable:$false] %s1506_s28 }
 0x261   : > { %s1508_s15 = scalar_lea.vmem %s1507_s28, 256  ;;  %p1509_p0 = scmp.lt.s32.totalorder %s1166_s21, %s1507_s28 }
 0x262   : > { %p1504_p11 = pnand %p1503_p10, %p1659_p4  ;;  %p1510_p1 = scmp.lt.s32.totalorder %s1508_s15, %s1502_s26 }
 0x263   : > { %v1147_v52 = vld [vmem:[#allocation2] sm:$0xff] }
 0x264   : > { %1149 = vst.msk [vmem:[%s186_s10] sm:$0xff] %vm1148_vm9, %v1147_v52  ;;  %p1505_p13 = pneg %p1504_p11  ;;  %p1511_p2 = por %p1510_p1, %p1509_p0 }
 0x266   : > { %p1512_p3 = pnand %p1511_p2, %p1505_p13 }
 0x268   : > { %1515 = shalt.err (!%p1512_p3)
}
 0x269   : > { %s1516_s29 = scalar_lea.hbm %s1163_s19, 128  ;;  %s1520_s10 = scalar_lea.hbm %s1815_s3, 384 }
 0x26a   : > { %p1517_p5 = scmp.ne.s32.totalorder %s1163_s19, %s1516_s29  ;;  %p1521_p9 = scmp.lt.s32.totalorder %s1163_s19, %s1815_s3 }
 0x26b   : > { %p1522_p12 = scmp.lt.s32.totalorder %s1520_s10, %s1516_s29 }
 0x26c   : > { %p1518_p6 = pnand %p1517_p5, %p1659_p4 }
 0x26d   : > { %p1523_p10 = por %p1522_p12, %p1521_p9 }
 0x26e   : > { %p1519_p7 = pneg %p1518_p6 }
 0x270   : > { %p1524_p11 = pnand %p1523_p10, %p1519_p7 }
 0x272   : > { %1527 = shalt.err (!%p1524_p11)
}
 0x273   : > { %1401 = dma.vmem_to_hbm [thread:$0]  (%p1659_p4), %s1166_s21, 128, %s1163_s19, %s1151_s23  }
 0x274 PF: > { %p1413_p13 = scmp.ge.s32.totalorder %s1582_s17, 2  ;;  %s1177_s5 = sand.u32 1, %s1562_s12  }
 0x275   : > { %s1178_s6 = scalar_lea.sflag [#allocation5], %s1177_s5 }
 0x276   : > { %p1408_p0 = pnand %p1413_p13, %p1666_p8 }
 0x278   : > { %p1409_p1 = pneg %p1408_p0 }
 0x27a   : > { %1557 = dma.done.wait (%p1409_p1), %s1178_s6, 128  }
 0x27b   : > { %1559 = vsyncadd (%p1409_p1), %s1178_s6, 4294967168  ;;  %s17_s17 = sadd.s32 1, %s1582_s17   ;;  %s1820_s12 = smov %s1566_s13 }
 0x27c   : > { %p14_p2 = scmp.ge.s32.totalorder %s17_s17, 5   ;;  %s1821_s13 = smov %s1570_s14 }
 0x27d   : > { %s1822_s14 = smov %s1672_s25  ;;  %s1823_s15 = smov %s1578_s16 }
 0x27e   : > { %s1824_s16 = smov %s1826_s20  ;;  %16 = sbr.rel (!%p14_p2) target bundleno = 5 (0x5), region = 74 }
 0x283   :  { %1183 = vsyncpa [#allocation4], 1 }
 0x284   :  { %1185 = vsyncpa [#allocation4 + $0x1], 1 }
 0x285   :  { %1186 = vsyncpa [#allocation5], 1 }
 0x286   :  { %1188 = vsyncpa [#allocation5 + $0x1], 1 }

</bundles_post_ra>
